<compile_context>
chip_gen: v5e
topology: v5e:2x2
jax: 0.10.0
libtpu: 0.0.40
codegen_flags: <defaults>
</compile_context>

<pallas_src>
import math

import jax
import jax.numpy as jnp
from jax.experimental import pallas as pl
from jax.experimental.pallas import tpu as pltpu

_LANE = 128


def _cdiv(a, b):
    return (a + b - 1) // b


def _round_up(n, m):
    return ((n + m - 1) // m) * m


def _round_down(n, m):
    return (n // m) * m


def _min_sublane(itemsize):
    if itemsize >= 4:
        return 8
    if itemsize == 2:
        return 16
    return 32


def _vmem_capacity_bytes():
    try:
        return int(pltpu.get_tpu_info().vmem_capacity_bytes)
    except Exception:
        return 64 * 1024 * 1024  # conservative fallback: v7x per-TensorCore VMEM


def _footprint_bytes(tile_m, tile_n, in_dim, bottle_dim, x_isz, w_isz,
                     a_bufs, b_bufs):
    x_buf = 2 * tile_m * in_dim * x_isz              # x tile, double-buffered
    o_buf = 2 * tile_m * tile_n * x_isz              # out tile, double-buffered
    a_buf = a_bufs * in_dim * bottle_dim * w_isz     # lora_A
    b_buf = b_bufs * bottle_dim * tile_n * w_isz     # lora_B (tile)
    h_buf = tile_m * bottle_dim * w_isz              # h scratch
    # in-kernel f32 matmul results before the dtype cast
    f32_tmp = tile_m * bottle_dim * 4 + tile_m * tile_n * 4
    return x_buf + o_buf + a_buf + b_buf + h_buf + f32_tmp


def _plan_tiles(m_rows, in_dim, bottle_dim, x_isz, w_isz, budget):
    gran = _min_sublane(x_isz)

    # ---- tile_n: keep B fully resident unless the weights blow the budget ----
    a_bytes = in_dim * bottle_dim * w_isz
    b_bytes = bottle_dim * in_dim * w_isz
    tile_n = in_dim
    if (a_bytes + b_bytes) > budget // 2 and in_dim > _LANE:
        avail = max(budget // 2 - a_bytes, 2 * bottle_dim * w_isz * _LANE)
        tile_n = _round_down(avail // max(2 * bottle_dim * w_isz, 1), _LANE)
        tile_n = max(_LANE, min(tile_n, _round_down(in_dim, _LANE)))
        # TODO(synk): if lora_A alone exceeds VMEM (huge in_dim * bottle_dim), a
        # K-tiled variant with an f32 accumulator would be needed.
    num_n = _cdiv(in_dim, tile_n)

    # ---- tile_m: largest row tile that fits the budget ----
    b_bufs = 1 if num_n == 1 else 2
    fixed = a_bytes + b_bufs * bottle_dim * tile_n * w_isz
    per_row = (2 * in_dim * x_isz            # x tile (x2 buffers)
               + 2 * tile_n * x_isz          # out tile (x2 buffers)
               + bottle_dim * w_isz          # h scratch
               + bottle_dim * 4 + tile_n * 4)  # f32 matmul temporaries
    max_rows = max((budget - fixed) // max(per_row, 1), gran)

    if m_rows <= max_rows:
        tile_m, num_m = m_rows, 1            # full-extent block: always legal
        if m_rows >= 2 * gran:               # let v7x's second TensorCore work
            tile_m = _round_up(_cdiv(m_rows, 2), gran)
            num_m = _cdiv(m_rows, tile_m)
    else:
        tile_m = (_round_down(max_rows, 256) if max_rows >= 256
                  else _round_down(max_rows, gran))
        tile_m = max(gran, min(tile_m, _round_down(m_rows, gran)))
        num_m = _cdiv(m_rows, tile_m)
    return tile_m, tile_n, num_m, num_n


def _lora_kernel(x_ref, a_ref, b_ref, o_ref, h_ref):
    # h = x @ A_scaled is only recomputed when the row tile changes (j == 0)
    # and is reused across all output-column tiles of this row tile.
    @pl.when(pl.program_id(1) == 0)
    def _():
        h = jnp.dot(x_ref[...], a_ref[...], preferred_element_type=jnp.float32)
        h_ref[...] = h.astype(h_ref.dtype)

    o_ref[...] = jnp.dot(h_ref[...], b_ref[...],
                         preferred_element_type=jnp.float32).astype(o_ref.dtype)


def _call_pallas(x2d, a_scaled, b_cast, tile_m, tile_n, num_m, num_n,
                 vmem_limit, single_buffer_weights):
    m_rows, in_dim = x2d.shape
    bottle_dim = a_scaled.shape[1]
    x_isz = jnp.dtype(x2d.dtype).itemsize
    w_isz = jnp.dtype(a_scaled.dtype).itemsize

    def weight_spec(shape, index_map, constant_index):
        if single_buffer_weights and constant_index:
            # Constant index_map: double-buffering buys nothing, halve VMEM.
            return pl.BlockSpec(shape, index_map, pipeline_mode=pl.Buffered(1))
        return pl.BlockSpec(shape, index_map)

    in_specs = [
        pl.BlockSpec((tile_m, in_dim), lambda i, j: (i, 0)),                 # x
        weight_spec((in_dim, bottle_dim), lambda i, j: (0, 0), True),        # A
        weight_spec((bottle_dim, tile_n), lambda i, j: (0, j), num_n == 1),  # B
    ]
    out_spec = pl.BlockSpec((tile_m, tile_n), lambda i, j: (i, j))

    flops = 4 * m_rows * in_dim * bottle_dim
    bytes_accessed = (2 * m_rows * in_dim * x_isz          # x + out
                      + 2 * in_dim * bottle_dim * w_isz)   # A + B

    return pl.pallas_call(
        _lora_kernel,
        out_shape=jax.ShapeDtypeStruct((m_rows, in_dim), x2d.dtype),
        grid_spec=pltpu.PrefetchScalarGridSpec(
            num_scalar_prefetch=0,
            grid=(num_m, num_n),
            in_specs=in_specs,
            out_specs=out_spec,
            scratch_shapes=[pltpu.VMEM((tile_m, bottle_dim), x2d.dtype)],
        ),
        compiler_params=pltpu.CompilerParams(
            dimension_semantics=("parallel", "arbitrary"),
            vmem_limit_bytes=int(vmem_limit),
        ),
        cost_estimate=pl.CostEstimate(
            flops=flops, transcendentals=0, bytes_accessed=bytes_accessed),
    )(x2d, a_scaled, b_cast)


def lora_forward(x, lora_A, lora_B):
    """x: (..., in_dim); returns same shape and dtype as x."""
    in_dim, bottle_dim = lora_A.shape
    scaling = 1.0 / bottle_dim
    compute_dtype = x.dtype

    # Fold the static scaling into A and cast the weights to the activation
    # dtype once (fast bf16 MXU path, halved weight HBM/VMEM when x is bf16).
    a_scaled = (lora_A * scaling).astype(compute_dtype)
    b_cast = lora_B.astype(compute_dtype)

    orig_shape = x.shape
    x2d = x.reshape(-1, in_dim)
    m_rows = x2d.shape[0]
    x_isz = jnp.dtype(compute_dtype).itemsize
    w_isz = x_isz

    cap = _vmem_capacity_bytes()
    budget = int(0.65 * cap)                 # working-set budget per TensorCore
    tile_m, tile_n, num_m, num_n = _plan_tiles(
        m_rows, in_dim, bottle_dim, x_isz, w_isz, budget)

    # Size the scoped-VMEM limit from the worst-case footprint (assume the
    # double-buffered-weights fallback), plus headroom for compiler temps.
    footprint = _footprint_bytes(tile_m, tile_n, in_dim, bottle_dim,
                                 x_isz, w_isz, a_bufs=2, b_bufs=2)
    vmem_limit = min(int(0.9 * cap), max(32 << 20, footprint + (8 << 20)))

    try:
        y2d = _call_pallas(x2d, a_scaled, b_cast, tile_m, tile_n, num_m, num_n,
                           vmem_limit, single_buffer_weights=True)
    except Exception:
        # Fallback for JAX versions where pl.Buffered(1) on a constant-index
        # operand is not accepted.
        y2d = _call_pallas(x2d, a_scaled, b_cast, tile_m, tile_n, num_m, num_n,
                           vmem_limit, single_buffer_weights=False)
    return y2d.reshape(orig_shape)


def init_lora_params(key, in_dim, mlp_ratio=0.25):
    """Replicates the PyTorch __init__:
       lora_A: kaiming_uniform_(a=sqrt(5)) on shape (in_dim, bottle_dim)
               -> fan_in = bottle_dim, bound = 1/sqrt(bottle_dim)
       lora_B: zeros of shape (bottle_dim, in_dim)
    """
    bottle_dim = int(in_dim * mlp_ratio)
    bound = 1.0 / math.sqrt(bottle_dim)
    lora_A = jax.random.uniform(
        key, (in_dim, bottle_dim), dtype=jnp.float32, minval=-bound, maxval=bound
    )
    lora_B = jnp.zeros((bottle_dim, in_dim), dtype=jnp.float32)
    return lora_A, lora_B


if __name__ == "__main__":
    key = jax.random.PRNGKey(0)
    k_x, k_a, k_b = jax.random.split(key, 3)

    batch, seq, in_dim = 2, 8, 32
    mlp_ratio = 0.25
    bottle_dim = int(in_dim * mlp_ratio)
    scaling = 1.0 / bottle_dim

    x = jax.random.normal(k_x, (batch, seq, in_dim), dtype=jnp.float32)

    # Test 1: module-faithful init (lora_B is zero -> output exactly zero).
    lora_A, lora_B_zero = init_lora_params(k_a, in_dim, mlp_ratio)
    out_zero = jax.block_until_ready(lora_forward(x, lora_A, lora_B_zero))
    ref_zero = scaling * ((x @ lora_A) @ lora_B_zero)
    assert out_zero.shape == x.shape
    assert out_zero.dtype == x.dtype
    assert jnp.allclose(out_zero, ref_zero, atol=1e-5, rtol=1e-5)

    # Test 2: non-trivial lora_B (catches wrong contraction / missing scaling /
    # transposed operands) on the f32 path.
    lora_B_rand = jax.random.normal(k_b, (bottle_dim, in_dim), dtype=jnp.float32)
    out = jax.block_until_ready(lora_forward(x, lora_A, lora_B_rand))
    ref = scaling * ((x @ lora_A) @ lora_B_rand)
    assert out.shape == x.shape
    assert out.dtype == x.dtype
    assert jnp.allclose(out, ref, atol=1e-4, rtol=1e-4)

    # Test 3: bf16 activations exercise the cast-weights fast path; compare
    # against a reference that follows the same dtype chain as the kernel.
    xb = x.astype(jnp.bfloat16)
    out_bf16 = jax.block_until_ready(lora_forward(xb, lora_A, lora_B_rand))
    a_b = (lora_A * scaling).astype(jnp.bfloat16)
    b_b = lora_B_rand.astype(jnp.bfloat16)
    h_b = jnp.dot(xb, a_b, preferred_element_type=jnp.float32).astype(jnp.bfloat16)
    ref_b = jnp.dot(h_b, b_b, preferred_element_type=jnp.float32).astype(jnp.bfloat16)
    assert out_bf16.shape == x.shape
    assert out_bf16.dtype == jnp.bfloat16
    assert jnp.allclose(out_bf16.astype(jnp.float32), ref_b.astype(jnp.float32),
                        atol=2e-2, rtol=2e-2)

    print("KERNEL_OK")
</pallas_src>

<mosaic_0001>
module attributes {stable_mosaic.version = 11 : i64} {
  func.func @_lora_kernel(%arg0: i32, %arg1: i32, %arg2: memref<8x32xf32, #tpu.memory_space<vmem>>, %arg3: memref<32x8xf32, #tpu.memory_space<vmem>>, %arg4: memref<8x32xf32, #tpu.memory_space<vmem>>, %arg5: memref<8x32xf32, #tpu.memory_space<vmem>>, %arg6: memref<8x8xf32, #tpu.memory_space<vmem>>) attributes {dimension_semantics = [#tpu.dimension_semantics<parallel>, #tpu.dimension_semantics<arbitrary>], iteration_bounds = array<i64: 2, 1>, scalar_prefetch = 0 : i64, scratch_operands = 1 : i64, tpu.core_type = #tpu.core_type<tc>, window_params = [{transform_indices = @transform_0, window_bounds = array<i64: 8, 32>}, {pipeline_mode = #tpu.pipeline_mode<synchronous>, transform_indices = @transform_1, window_bounds = array<i64: 32, 8>}, {pipeline_mode = #tpu.pipeline_mode<synchronous>, transform_indices = @transform_2, window_bounds = array<i64: 8, 32>}, {transform_indices = @transform_3, window_bounds = array<i64: 8, 32>}]} {
    %c0_i32 = arith.constant 0 : i32
    %0 = arith.cmpi eq, %arg1, %c0_i32 : i32
    %1 = arith.extui %0 : i1 to i32
    %c0_i32_0 = arith.constant 0 : i32
    %2 = arith.cmpi ne, %1, %c0_i32_0 : i32
    scf.if %2 {
      %c0_6 = arith.constant 0 : index
      %c0_7 = arith.constant 0 : index
      %7 = vector.load %arg2[%c0_6, %c0_7] : memref<8x32xf32, #tpu.memory_space<vmem>>, vector<8x32xf32>
      %c0_8 = arith.constant 0 : index
      %c0_9 = arith.constant 0 : index
      %8 = vector.load %arg3[%c0_8, %c0_9] : memref<32x8xf32, #tpu.memory_space<vmem>>, vector<32x8xf32>
      %cst_10 = arith.constant dense<0.000000e+00> : vector<8x8xf32>
      %9 = tpu.matmul %7, %8, %cst_10 {dimension_numbers = #tpu.dot_dimension_numbers<[1], [0], [0], [1], [0, 0, 1, 1], [], []>} : vector<8x32xf32>, vector<32x8xf32>, vector<8x8xf32> -> vector<8x8xf32>
      %c0_11 = arith.constant 0 : index
      %c0_12 = arith.constant 0 : index
      %10 = vector.load %arg6[%c0_11, %c0_12] : memref<8x8xf32, #tpu.memory_space<vmem>>, vector<8x8xf32>
      tpu.vector_store %arg6[%c0_11, %c0_12], %9 {strides = array<i32>} : memref<8x8xf32, #tpu.memory_space<vmem>>, vector<8x8xf32>,
    } else {
    }
    %c0 = arith.constant 0 : index
    %c0_1 = arith.constant 0 : index
    %3 = vector.load %arg6[%c0, %c0_1] : memref<8x8xf32, #tpu.memory_space<vmem>>, vector<8x8xf32>
    %c0_2 = arith.constant 0 : index
    %c0_3 = arith.constant 0 : index
    %4 = vector.load %arg4[%c0_2, %c0_3] : memref<8x32xf32, #tpu.memory_space<vmem>>, vector<8x32xf32>
    %cst = arith.constant dense<0.000000e+00> : vector<8x32xf32>
    %5 = tpu.matmul %3, %4, %cst {dimension_numbers = #tpu.dot_dimension_numbers<[1], [0], [0], [1], [0, 0, 1, 1], [], []>} : vector<8x8xf32>, vector<8x32xf32>, vector<8x32xf32> -> vector<8x32xf32>
    %c0_4 = arith.constant 0 : index
    %c0_5 = arith.constant 0 : index
    %6 = vector.load %arg5[%c0_4, %c0_5] : memref<8x32xf32, #tpu.memory_space<vmem>>, vector<8x32xf32>
    tpu.vector_store %arg5[%c0_4, %c0_5], %5 {strides = array<i32>} : memref<8x32xf32, #tpu.memory_space<vmem>>, vector<8x32xf32>,
    return
  }
  func.func @transform_0(%arg0: i32, %arg1: i32) -> (i32, i32) {
    %c0_i32 = arith.constant 0 : i32
    %c0_i32_0 = arith.constant 0 : i32
    return %arg0, %c0_i32 : i32, i32
  }
  func.func @transform_1(%arg0: i32, %arg1: i32) -> (i32, i32) {
    %c0_i32 = arith.constant 0 : i32
    %c0_i32_0 = arith.constant 0 : i32
    %c0_i32_1 = arith.constant 0 : i32
    return %c0_i32, %c0_i32_0 : i32, i32
  }
  func.func @transform_2(%arg0: i32, %arg1: i32) -> (i32, i32) {
    %c0_i32 = arith.constant 0 : i32
    %c0_i32_0 = arith.constant 0 : i32
    return %c0_i32, %arg1 : i32, i32
  }
  func.func @transform_3(%arg0: i32, %arg1: i32) -> (i32, i32) {
    %c0_i32 = arith.constant 0 : i32
    return %arg0, %arg1 : i32, i32
  }
}

module attributes {stable_mosaic.version = 11 : i64} {
  func.func @_lora_kernel(%arg0: i32, %arg1: i32, %arg2: memref<8x32xf32, #tpu.memory_space<vmem>>, %arg3: memref<32x8xf32, #tpu.memory_space<vmem>>, %arg4: memref<8x32xf32, #tpu.memory_space<vmem>>, %arg5: memref<8x32xf32, #tpu.memory_space<vmem>>, %arg6: memref<8x8xf32, #tpu.memory_space<vmem>>) attributes {dimension_semantics = [#tpu.dimension_semantics<parallel>, #tpu.dimension_semantics<arbitrary>], iteration_bounds = array<i64: 2, 1>, scalar_prefetch = 0 : i64, scratch_operands = 1 : i64, tpu.core_type = #tpu.core_type<tc>, window_params = [{transform_indices = @transform_0, window_bounds = array<i64: 8, 32>}, {pipeline_mode = #tpu.pipeline_mode<synchronous>, transform_indices = @transform_1, window_bounds = array<i64: 32, 8>}, {transform_indices = @transform_2, window_bounds = array<i64: 8, 32>}, {transform_indices = @transform_3, window_bounds = array<i64: 8, 32>}]} {
    %c0_i32 = arith.constant 0 : i32
    %0 = arith.cmpi eq, %arg1, %c0_i32 : i32
    %1 = arith.extui %0 : i1 to i32
    %c0_i32_0 = arith.constant 0 : i32
    %2 = arith.cmpi ne, %1, %c0_i32_0 : i32
    scf.if %2 {
      %c0_6 = arith.constant 0 : index
      %c0_7 = arith.constant 0 : index
      %7 = vector.load %arg2[%c0_6, %c0_7] : memref<8x32xf32, #tpu.memory_space<vmem>>, vector<8x32xf32>
      %c0_8 = arith.constant 0 : index
      %c0_9 = arith.constant 0 : index
      %8 = vector.load %arg3[%c0_8, %c0_9] : memref<32x8xf32, #tpu.memory_space<vmem>>, vector<32x8xf32>
      %cst_10 = arith.constant dense<0.000000e+00> : vector<8x8xf32>
      %9 = tpu.matmul %7, %8, %cst_10 {dimension_numbers = #tpu.dot_dimension_numbers<[1], [0], [0], [1], [0, 0, 1, 1], [], []>} : vector<8x32xf32>, vector<32x8xf32>, vector<8x8xf32> -> vector<8x8xf32>
      %c0_11 = arith.constant 0 : index
      %c0_12 = arith.constant 0 : index
      %10 = vector.load %arg6[%c0_11, %c0_12] : memref<8x8xf32, #tpu.memory_space<vmem>>, vector<8x8xf32>
      tpu.vector_store %arg6[%c0_11, %c0_12], %9 {strides = array<i32>} : memref<8x8xf32, #tpu.memory_space<vmem>>, vector<8x8xf32>,
    } else {
    }
    %c0 = arith.constant 0 : index
    %c0_1 = arith.constant 0 : index
    %3 = vector.load %arg6[%c0, %c0_1] : memref<8x8xf32, #tpu.memory_space<vmem>>, vector<8x8xf32>
    %c0_2 = arith.constant 0 : index
    %c0_3 = arith.constant 0 : index
    %4 = vector.load %arg4[%c0_2, %c0_3] : memref<8x32xf32, #tpu.memory_space<vmem>>, vector<8x32xf32>
    %cst = arith.constant dense<0.000000e+00> : vector<8x32xf32>
    %5 = tpu.matmul %3, %4, %cst {dimension_numbers = #tpu.dot_dimension_numbers<[1], [0], [0], [1], [0, 0, 1, 1], [], []>} : vector<8x8xf32>, vector<8x32xf32>, vector<8x32xf32> -> vector<8x32xf32>
    %c0_4 = arith.constant 0 : index
    %c0_5 = arith.constant 0 : index
    %6 = vector.load %arg5[%c0_4, %c0_5] : memref<8x32xf32, #tpu.memory_space<vmem>>, vector<8x32xf32>
    tpu.vector_store %arg5[%c0_4, %c0_5], %5 {strides = array<i32>} : memref<8x32xf32, #tpu.memory_space<vmem>>, vector<8x32xf32>,
    return
  }
  func.func @transform_0(%arg0: i32, %arg1: i32) -> (i32, i32) {
    %c0_i32 = arith.constant 0 : i32
    %c0_i32_0 = arith.constant 0 : i32
    return %arg0, %c0_i32 : i32, i32
  }
  func.func @transform_1(%arg0: i32, %arg1: i32) -> (i32, i32) {
    %c0_i32 = arith.constant 0 : i32
    %c0_i32_0 = arith.constant 0 : i32
    %c0_i32_1 = arith.constant 0 : i32
    return %c0_i32, %c0_i32_0 : i32, i32
  }
  func.func @transform_2(%arg0: i32, %arg1: i32) -> (i32, i32) {
    %c0_i32 = arith.constant 0 : i32
    %c0_i32_0 = arith.constant 0 : i32
    return %c0_i32, %arg1 : i32, i32
  }
  func.func @transform_3(%arg0: i32, %arg1: i32) -> (i32, i32) {
    %c0_i32 = arith.constant 0 : i32
    return %arg0, %arg1 : i32, i32
  }
}

</mosaic_0001>

<bundles_post_ra>
// kernel: tpu_custom_call.1
= control target key start
LH: loop header
LB: loop body
LE: loop exit
PB: predicated region body
PF: predicated region fallthrough
CT: control target
= control target key end

     0   :  { %8 = vsyncpa [#allocation4], 0  ;;  %s643_s0 = inlined_call_operand.vmem [shape: f32[16,32], index: 0, kind: input, shape index: {}]   ;;  %s644_s1 = inlined_call_operand.vmem [shape: f32[32,8], index: 1, kind: input, shape index: {}]   ;;  %s645_s2 = inlined_call_operand.vmem [shape: f32[8,32], index: 2, kind: input, shape index: {}]   ;;  %s646_s3 = inlined_call_operand.hbm [shape: f32[16,32], index: 3, kind: output, shape index: {}]  }
   0x1   :  { %10 = vsyncpa [#allocation4 + $0x1], 0  ;;  %s529_s12 = smov 0   ;;  %s531_s13 = smov 0  }
   0x2   :  { %s533_s14 = smov 0   ;;  %s535_s15 = smov 0  }
   0x3   :  { %s537_s16 = smov 0   ;;  %s539_s17 = smov 0  }
   0x4 LB: > { %s360_s18 = sadd.s32 4294967295, %s507_s17   ;;  %s361_s19 = sadd.s32 4294967294, %s507_s17   ;;  %s507_s17 = sphi %s539_s17, %s16_s17   ;;  %s503_s16 = sphi %s537_s16, %s653_s16   ;;  %s499_s15 = sphi %s535_s15, %s652_s15   ;;  %s495_s14 = sphi %s533_s14, %s651_s14   ;;  %s491_s13 = sphi %s531_s13, %s650_s13   ;;  %s487_s12 = sphi %s529_s12, %s649_s12  }
   0x5   : > { %s28_s20 = sadd.s32 1, %s503_s16  ;;  %s110_s21 = sadd.s32 1, %s495_s14 }
   0x6   : > { %p30_p0 = scmp.ge.s32.totalorder %s28_s20, 2  ;;  %p120_p1 = scmp.ne.s32.totalorder %s495_s14, %s491_s13 }
   0x7   : > { %p121_p2 = scmp.eq.s32.totalorder %s360_s18, 1  ;;  %p126_p3 = scmp.ne.s32.totalorder %s491_s13, %s487_s12 }
   0x8   : > { %s655_s20 = smov (%p30_p0, %s28_s20), 0  ;;  %p127_p5 = scmp.eq.s32.totalorder %s361_s19, 1 }
   0x9   : > { %p569_p4 = por %p121_p2, %p120_p1  ;;  %s105_s23 = ssub.s32 %s503_s16, %s655_s20 }
   0xa   : > { %p365_p6 = scmp.ge.s32.totalorder %s507_s17, 1  ;;  %p108_p7 = scmp.eq.s32.totalorder %s105_s23, 0 }
   0xb   : > { %p576_p8 = por %p127_p5, %p126_p3  ;;  %p162_p9 = scmp.lt.s32.totalorder %s507_s17, 3 }
   0xc   : > { %s582_s25 = scalar_select %p108_p7, %s495_s14, %s110_s21  }
   0xd   : > { %p163_p10 = pnand %p365_p6, %p162_p9 }
   0xe   : > { %p189_p11 = scmp.lt.s32.totalorder (!%p163_p10), %s499_s15, 1  ;;  %s186_s21 = sand.u32 (!%p163_p10), 1, %s491_s13  }
   0xf   : > { %166 = sbr.rel (%p163_p10) target bundleno = 291 (0x123), region = 32  ;;  %s366_s23 = sshll.u32 (!%p163_p10), %s186_s21, 3 }
  0x10   : > { %s371_s26 = sshll.u32 (!%p163_p10), %s499_s15, 3  ;;  %s188_s30 = scalar_lea.vmem (!%p163_p10), [#allocation3], %s366_s23 }
  0x11   : > { %s272_s29 = scalar_lea.hbm (!%p163_p10), %s646_s3, %s371_s26  ;;  %s274_s4 = sshll.u32 (!%p163_p10), %s188_s30, 4  ;;  %s275_s4 = int_to_ptr.vmem [resolvable:$true] %s274_s4 }
  0x12   : > { %s261_s6 = scalar_lea.sflag (!%p163_p10), [#allocation4], %s186_s21  ;;  %s449_s10 = scalar_lea.hbm (!%p163_p10), %s646_s3, 16 }
  0x14   : > { %v205_v0 = vld [vmem:[%s644_s1 + $0x18] sm:$0xff]  ;;  %v204_v1 = vld [vmem:[%s644_s1 + $0x10] sm:$0xff]  ;;  %v203_v2 = vld [vmem:[%s644_s1 + $0x8] sm:$0xff]  ;;  %s190_s5 = scalar_select %p189_p11, %s499_s15, 1  ;;  %vm206_vm0 = vcmask 261120   ;;  %vm230_vm1 = vcmask 64512  }
  0x15   : > { %222 = vmatpush.msra.mxu0 %v205_v0  ;;  %v202_v3 = vld [vmem:[%s644_s1] sm:$0xff] }
  0x16   : > { %s367_s8 = sshll.u32 %s190_s5, 3  ;;  %v233_v5 = vld [vmem:[%s645_s2] sm:$0xff]  ;;  %s276_s5 = sshll.u32 %s272_s29, 4  ;;  %s277_s5 = int_to_ptr.hbm [resolvable:$true] %s276_s5 }
  0x17   : > { %223 = vmatpush.msra.mxu0 %v204_v1  ;;  %s192_s11 = scalar_lea.vmem %s643_s0, %s367_s8  ;;  %253 = vmatpush.msra.mxu1 %v233_v5  ;;  %s443_s7 = sshra.s32 %s277_s5, 4  ;;  %s444_s7 = int_to_ptr.hbm [resolvable:$true] %s443_s7 }
  0x18   : > { %v201_v4 = vld [vmem:[%s192_s11] sm:$0xff]  ;;  %s445_s8 = scalar_lea.hbm %s444_s7, 8  ;;  %p450_p1 = scmp.lt.s32.totalorder %s444_s7, %s646_s3 }
  0x19   : > { %224 = vmatpush.msra.mxu0 %v203_v2  ;;  %p446_p12 = scmp.ne.s32.totalorder %s444_s7, %s445_s8  ;;  %p451_p2 = scmp.lt.s32.totalorder %s449_s10, %s445_s8 }
  0x1b   : > { %225 = vmatpush.msra.mxu0 %v202_v3  ;;  %p447_p13 = pnand %p446_p12, %p569_p4  ;;  %p452_p3 = por %p451_p2, %p450_p1 }
  0x1c   : > { %368 = vmatmul.msk.f32.vlgmr.msra.gmra.mxu0 %vm206_vm0, %v201_v4 }
  0x1d   : > { %p448_p0 = pneg %p447_p13 }
  0x1f   : > { %p453_p5 = pnand %p452_p3, %p448_p0 }
  0x99   : > { %v227_v6 = vpop.f32.mrf.mxu0 }
  0x9a   : > { %231 = vst.msk [vmem:[#allocation2] sm:$0xff] %vm230_vm1, %v227_v6 }
  0xa1   : > { %v232_v7 = vld [vmem:[#allocation2] sm:$0xff] }
  0xa2   : > { %369 = vmatmul.msk.f32.vlgmr.msra.gmra.mxu1 %vm230_vm1, %v232_v7 }
 0x11f   : > { %v255_v8 = vpop.f32.mrf.mxu1 }
 0x120   : > { %259 = vst.msk [vmem:[%s188_s30] sm:$0xff] %vm206_vm0, %v255_v8 }
 0x121   : > { %456 = shalt.err (!%p453_p5)
}
 0x122   : > { %374 = dma.vmem_to_hbm [thread:$0]  (%p569_p4), %s275_s4, 128, %s277_s5, %s261_s6  }
 0x123 PF: > { %p380_p6 = scmp.ge.s32.totalorder %s507_s17, 2  ;;  %s288_s19 = sand.u32 1, %s487_s12  }
 0x124   : > { %s289_s21 = scalar_lea.sflag [#allocation4], %s288_s19 }
 0x125   : > { %p377_p7 = pnand %p380_p6, %p576_p8 }
 0x127   : > { %p378_p9 = pneg %p377_p7 }
 0x129   : > { %482 = dma.done.wait (%p378_p9), %s289_s21, 128  }
 0x12a   : > { %484 = vsyncadd (%p378_p9), %s289_s21, 4294967168  ;;  %s16_s17 = sadd.s32 1, %s507_s17   ;;  %s649_s12 = smov %s491_s13 }
 0x12b   : > { %p13_p10 = scmp.ge.s32.totalorder %s16_s17, 4   ;;  %s650_s13 = smov %s495_s14 }
 0x12c   : > { %s651_s14 = smov %s582_s25  ;;  %s652_s15 = smov %s503_s16 }
 0x12d   : > { %s653_s16 = smov %s655_s20  ;;  %15 = sbr.rel (!%p13_p10) target bundleno = 4 (0x4), region = 74 }
 0x132   :  { %295 = vsyncpa [#allocation4], 1 }
 0x133   :  { %297 = vsyncpa [#allocation4 + $0x1], 1 }

// kernel: tpu_custom_call.1
= control target key start
LH: loop header
LB: loop body
LE: loop exit
PB: predicated region body
PF: predicated region fallthrough
CT: control target
= control target key end

     0   :  { %8 = vsyncpa [#allocation4], 0  ;;  %s643_s0 = inlined_call_operand.vmem [shape: f32[16,32], index: 0, kind: input, shape index: {}]   ;;  %s644_s1 = inlined_call_operand.vmem [shape: f32[32,8], index: 1, kind: input, shape index: {}]   ;;  %s645_s2 = inlined_call_operand.vmem [shape: f32[8,32], index: 2, kind: input, shape index: {}]   ;;  %s646_s3 = inlined_call_operand.hbm [shape: f32[16,32], index: 3, kind: output, shape index: {}]  }
   0x1   :  { %10 = vsyncpa [#allocation4 + $0x1], 0  ;;  %s529_s12 = smov 0   ;;  %s531_s13 = smov 0  }
   0x2   :  { %s533_s14 = smov 0   ;;  %s535_s15 = smov 0  }
   0x3   :  { %s537_s16 = smov 0   ;;  %s539_s17 = smov 0  }
   0x4 LB: > { %s360_s18 = sadd.s32 4294967295, %s507_s17   ;;  %s361_s19 = sadd.s32 4294967294, %s507_s17   ;;  %s507_s17 = sphi %s539_s17, %s16_s17   ;;  %s503_s16 = sphi %s537_s16, %s653_s16   ;;  %s499_s15 = sphi %s535_s15, %s652_s15   ;;  %s495_s14 = sphi %s533_s14, %s651_s14   ;;  %s491_s13 = sphi %s531_s13, %s650_s13   ;;  %s487_s12 = sphi %s529_s12, %s649_s12  }
   0x5   : > { %s28_s20 = sadd.s32 1, %s503_s16  ;;  %s110_s21 = sadd.s32 1, %s495_s14 }
   0x6   : > { %p30_p0 = scmp.ge.s32.totalorder %s28_s20, 2  ;;  %p120_p1 = scmp.ne.s32.totalorder %s495_s14, %s491_s13 }
   0x7   : > { %p121_p2 = scmp.eq.s32.totalorder %s360_s18, 1  ;;  %p126_p3 = scmp.ne.s32.totalorder %s491_s13, %s487_s12 }
   0x8   : > { %s655_s20 = smov (%p30_p0, %s28_s20), 0  ;;  %p127_p5 = scmp.eq.s32.totalorder %s361_s19, 1 }
   0x9   : > { %p569_p4 = por %p121_p2, %p120_p1  ;;  %s105_s23 = ssub.s32 %s503_s16, %s655_s20 }
   0xa   : > { %p365_p6 = scmp.ge.s32.totalorder %s507_s17, 1  ;;  %p108_p7 = scmp.eq.s32.totalorder %s105_s23, 0 }
   0xb   : > { %p576_p8 = por %p127_p5, %p126_p3  ;;  %p162_p9 = scmp.lt.s32.totalorder %s507_s17, 3 }
   0xc   : > { %s582_s25 = scalar_select %p108_p7, %s495_s14, %s110_s21  }
   0xd   : > { %p163_p10 = pnand %p365_p6, %p162_p9 }
   0xe   : > { %p189_p11 = scmp.lt.s32.totalorder (!%p163_p10), %s499_s15, 1  ;;  %s186_s21 = sand.u32 (!%p163_p10), 1, %s491_s13  }
   0xf   : > { %166 = sbr.rel (%p163_p10) target bundleno = 291 (0x123), region = 32  ;;  %s366_s23 = sshll.u32 (!%p163_p10), %s186_s21, 3 }
  0x10   : > { %s371_s26 = sshll.u32 (!%p163_p10), %s499_s15, 3  ;;  %s188_s30 = scalar_lea.vmem (!%p163_p10), [#allocation3], %s366_s23 }
  0x11   : > { %s272_s29 = scalar_lea.hbm (!%p163_p10), %s646_s3, %s371_s26  ;;  %s274_s4 = sshll.u32 (!%p163_p10), %s188_s30, 4  ;;  %s275_s4 = int_to_ptr.vmem [resolvable:$true] %s274_s4 }
  0x12   : > { %s261_s6 = scalar_lea.sflag (!%p163_p10), [#allocation4], %s186_s21  ;;  %s449_s10 = scalar_lea.hbm (!%p163_p10), %s646_s3, 16 }
  0x14   : > { %v205_v0 = vld [vmem:[%s644_s1 + $0x18] sm:$0xff]  ;;  %v204_v1 = vld [vmem:[%s644_s1 + $0x10] sm:$0xff]  ;;  %v203_v2 = vld [vmem:[%s644_s1 + $0x8] sm:$0xff]  ;;  %s190_s5 = scalar_select %p189_p11, %s499_s15, 1  ;;  %vm206_vm0 = vcmask 261120   ;;  %vm230_vm1 = vcmask 64512  }
  0x15   : > { %222 = vmatpush.msra.mxu0 %v205_v0  ;;  %v202_v3 = vld [vmem:[%s644_s1] sm:$0xff] }
  0x16   : > { %s367_s8 = sshll.u32 %s190_s5, 3  ;;  %v233_v5 = vld [vmem:[%s645_s2] sm:$0xff]  ;;  %s276_s5 = sshll.u32 %s272_s29, 4  ;;  %s277_s5 = int_to_ptr.hbm [resolvable:$true] %s276_s5 }
  0x17   : > { %223 = vmatpush.msra.mxu0 %v204_v1  ;;  %s192_s11 = scalar_lea.vmem %s643_s0, %s367_s8  ;;  %253 = vmatpush.msra.mxu1 %v233_v5  ;;  %s443_s7 = sshra.s32 %s277_s5, 4  ;;  %s444_s7 = int_to_ptr.hbm [resolvable:$true] %s443_s7 }
  0x18   : > { %v201_v4 = vld [vmem:[%s192_s11] sm:$0xff]  ;;  %s445_s8 = scalar_lea.hbm %s444_s7, 8  ;;  %p450_p1 = scmp.lt.s32.totalorder %s444_s7, %s646_s3 }
  0x19   : > { %224 = vmatpush.msra.mxu0 %v203_v2  ;;  %p446_p12 = scmp.ne.s32.totalorder %s444_s7, %s445_s8  ;;  %p451_p2 = scmp.lt.s32.totalorder %s449_s10, %s445_s8 }
  0x1b   : > { %225 = vmatpush.msra.mxu0 %v202_v3  ;;  %p447_p13 = pnand %p446_p12, %p569_p4  ;;  %p452_p3 = por %p451_p2, %p450_p1 }
  0x1c   : > { %368 = vmatmul.msk.f32.vlgmr.msra.gmra.mxu0 %vm206_vm0, %v201_v4 }
  0x1d   : > { %p448_p0 = pneg %p447_p13 }
  0x1f   : > { %p453_p5 = pnand %p452_p3, %p448_p0 }
  0x99   : > { %v227_v6 = vpop.f32.mrf.mxu0 }
  0x9a   : > { %231 = vst.msk [vmem:[#allocation2] sm:$0xff] %vm230_vm1, %v227_v6 }
  0xa1   : > { %v232_v7 = vld [vmem:[#allocation2] sm:$0xff] }
  0xa2   : > { %369 = vmatmul.msk.f32.vlgmr.msra.gmra.mxu1 %vm230_vm1, %v232_v7 }
 0x11f   : > { %v255_v8 = vpop.f32.mrf.mxu1 }
 0x120   : > { %259 = vst.msk [vmem:[%s188_s30] sm:$0xff] %vm206_vm0, %v255_v8 }
 0x121   : > { %456 = shalt.err (!%p453_p5)
}
 0x122   : > { %374 = dma.vmem_to_hbm [thread:$0]  (%p569_p4), %s275_s4, 128, %s277_s5, %s261_s6  }
 0x123 PF: > { %p380_p6 = scmp.ge.s32.totalorder %s507_s17, 2  ;;  %s288_s19 = sand.u32 1, %s487_s12  }
 0x124   : > { %s289_s21 = scalar_lea.sflag [#allocation4], %s288_s19 }
 0x125   : > { %p377_p7 = pnand %p380_p6, %p576_p8 }
 0x127   : > { %p378_p9 = pneg %p377_p7 }
 0x129   : > { %482 = dma.done.wait (%p378_p9), %s289_s21, 128  }
 0x12a   : > { %484 = vsyncadd (%p378_p9), %s289_s21, 4294967168  ;;  %s16_s17 = sadd.s32 1, %s507_s17   ;;  %s649_s12 = smov %s491_s13 }
 0x12b   : > { %p13_p10 = scmp.ge.s32.totalorder %s16_s17, 4   ;;  %s650_s13 = smov %s495_s14 }
 0x12c   : > { %s651_s14 = smov %s582_s25  ;;  %s652_s15 = smov %s503_s16 }
 0x12d   : > { %s653_s16 = smov %s655_s20  ;;  %15 = sbr.rel (!%p13_p10) target bundleno = 4 (0x4), region = 74 }
 0x132   :  { %295 = vsyncpa [#allocation4], 1 }
 0x133   :  { %297 = vsyncpa [#allocation4 + $0x1], 1 }

</bundles_post_ra>
